<compile_context>
chip_gen: v7x
topology: tpu7x:2x2x1
jax: 0.10.0
libtpu: 0.0.40
codegen_flags: <defaults>
</compile_context>

<pallas_src>
import jax
import jax.numpy as jnp
from jax import lax
from jax.experimental import pallas as pl
from jax.experimental.pallas import tpu as pltpu


def _round_up(n, m):
    return ((n + m - 1) // m) * m


def _linear_reward_kernel(x_ref, w1_ref, w2_ref, b2_ref, o_ref):
    # fc1 + folded bias: [H, K] x [bt, K], contracting K -> [H, bt]  (NT matmul)
    h = lax.dot_general(
        w1_ref[...], x_ref[...],
        dimension_numbers=(((1,), (1,)), ((), ())),
        preferred_element_type=jnp.float32,
    )
    # ELU (alpha = 1.0): x if x > 0 else exp(x) - 1.
    # Clamp the exp argument so the discarded positive branch stays finite.
    h = jnp.where(h > 0, h, jnp.exp(jnp.minimum(h, 0.0)) - 1.0)
    # fc2: [1, H] @ [H, bt] -> [1, bt]  (lane-dense output -> unmasked stores)
    y = jnp.dot(w2_ref[...], h, preferred_element_type=jnp.float32)
    o_ref[...] = (y + b2_ref[...]).astype(o_ref.dtype)


def linear_reward_forward(x, w1, b1, w2, b2, *, b_tile=2048):
    """Forward pass of TorchLinearReward.

    x  : [B, n_in]        input batch
    w1 : [n_h1, n_in]     fc1.weight (PyTorch [out, in] orientation)
    b1 : [n_h1]           fc1.bias
    w2 : [n_h2, n_h1]     fc2.weight (n_h2 == 1)
    b2 : [n_h2]           fc2.bias
    returns [B, n_h2]
    """
    B, n_in = x.shape
    n_h1 = w1.shape[0]
    n_h2 = w2.shape[0]
    assert w1.shape == (n_h1, n_in)
    assert w2.shape == (n_h2, n_h1) and n_h2 == 1
    assert b1.shape == (n_h1,) and b2.shape == (n_h2,)

    # Hidden dim: sublane alignment (8) only -- the kernel is VPU/EUP-bound,
    # not MXU-bound, so don't pay for 512 rows of ELU when 400 will do.
    H = _round_up(n_h1, 8)
    K = n_in + 1  # +1 input column: the folded fc1 bias

    # Batch tile: as big as useful, but (a) lane-aligned, (b) at most half the
    # lane-rounded batch so the "parallel" grid has >= 2 tiles for v7x's two
    # TensorCores, (c) capped at b_tile to stay well inside scoped VMEM on
    # every generation (v5e default scoped limit is only 16 MiB).
    B_ceil = _round_up(B, 128)
    half = max(128, ((B_ceil // 2) // 128) * 128)
    bt = min(b_tile, half)
    B_pad = _round_up(B, bt)
    n_tiles = B_pad // bt

    # Wrapper layout plumbing (single pass over x: ones column + batch pad).
    ones = jnp.ones((B, 1), x.dtype)
    x_aug = jnp.pad(jnp.concatenate([x, ones], axis=1),
                    ((0, B_pad - B), (0, 0)))                      # [B_pad, K]
    w1_aug = jnp.concatenate([w1, b1.reshape(n_h1, 1)], axis=1)    # [n_h1, K]
    w1_p = jnp.pad(w1_aug, ((0, H - n_h1), (0, 0)))                # [H, K]
    w2_p = jnp.pad(w2, ((0, 0), (0, H - n_h1)))                    # [1, H]
    b2_2d = b2.reshape(1, 1)                                       # [1, 1]

    itemsize = jnp.dtype(x.dtype).itemsize
    cost = pl.CostEstimate(
        flops=int(2 * B_pad * H * (K + 1)),
        transcendentals=int(B_pad * H),
        bytes_accessed=int((B_pad * K + H * K + H + 1 + B_pad) * itemsize),
    )

    out = pl.pallas_call(
        _linear_reward_kernel,
        out_shape=jax.ShapeDtypeStruct((1, B_pad), x.dtype),
        grid_spec=pltpu.PrefetchScalarGridSpec(
            num_scalar_prefetch=0,
            grid=(n_tiles,),
            in_specs=[
                # x tiles stream along the batch axis (double-buffered by Pallas)
                pl.BlockSpec((bt, K), lambda j: (j, 0)),
                # weights / biases: constant index_map -> stay VMEM-resident
                pl.BlockSpec((H, K), lambda j: (0, 0)),
                pl.BlockSpec((1, H), lambda j: (0, 0)),
                pl.BlockSpec((1, 1), lambda j: (0, 0)),
            ],
            out_specs=pl.BlockSpec((1, bt), lambda j: (0, j)),
        ),
        compiler_params=pltpu.CompilerParams(
            dimension_semantics=("parallel",),     # batch tiles shard across TCs
            vmem_limit_bytes=32 * 1024 * 1024,     # explicit cap, safe on v5e/v6e/v7x
        ),
        cost_estimate=cost,
    )(x_aug, w1_p, w2_p, b2_2d)

    # Slice off the batch padding and restore the PyTorch [B, n_h2] shape.
    return out[0, :B].reshape(B, n_h2)


def init_params(key, n_input, n_h1=400, n_h2=1, dtype=jnp.float32):
    """Deterministic init mimicking nn.Linear's default uniform init.

    Weights are kept in PyTorch's [out_features, in_features] orientation.
    """
    k1, k2, k3, k4 = jax.random.split(key, 4)
    bound1 = 1.0 / jnp.sqrt(n_input)
    bound2 = 1.0 / jnp.sqrt(n_h1)
    w1 = jax.random.uniform(k1, (n_h1, n_input), dtype, -bound1, bound1)
    b1 = jax.random.uniform(k2, (n_h1,), dtype, -bound1, bound1)
    w2 = jax.random.uniform(k3, (n_h2, n_h1), dtype, -bound2, bound2)
    b2 = jax.random.uniform(k4, (n_h2,), dtype, -bound2, bound2)
    return w1, b1, w2, b2


def _reference(x, w1, b1, w2, b2):
    # Plain-JAX reference with PyTorch semantics: y = ELU(x @ W1^T + b1) @ W2^T + b2
    h = x @ w1.T + b1
    h = jnp.where(h > 0, h, jnp.expm1(jnp.minimum(h, 0.0)))
    return h @ w2.T + b2


if __name__ == "__main__":
    key = jax.random.PRNGKey(0)
    kx, kp, kx2 = jax.random.split(key, 3)

    n_input, n_h1, n_h2 = 32, 400, 1
    w1, b1, w2, b2 = init_params(kp, n_input, n_h1, n_h2)

    # Small batch (single tile).
    B = 8
    x = jax.random.normal(kx, (B, n_input), jnp.float32)
    out = jax.block_until_ready(linear_reward_forward(x, w1, b1, w2, b2))
    y_ref = _reference(x, w1, b1, w2, b2)
    assert out.shape == (B, n_h2)
    assert jnp.allclose(out, y_ref, atol=1e-5, rtol=1e-5), float(
        jnp.max(jnp.abs(out - y_ref))
    )

    # Non-tile-aligned batch (exercises multi-tile grid + batch padding).
    B2 = 300
    x2 = jax.random.normal(kx2, (B2, n_input), jnp.float32)
    out2 = jax.block_until_ready(linear_reward_forward(x2, w1, b1, w2, b2))
    y_ref2 = _reference(x2, w1, b1, w2, b2)
    assert out2.shape == (B2, n_h2)
    assert jnp.allclose(out2, y_ref2, atol=1e-5, rtol=1e-5), float(
        jnp.max(jnp.abs(out2 - y_ref2))
    )

    print("KERNEL_OK")
</pallas_src>

<mosaic_0001>
module attributes {stable_mosaic.version = 11 : i64} {
  func.func @_linear_reward_kernel(%arg0: i32, %arg1: memref<128x33xf32, #tpu.memory_space<vmem>>, %arg2: memref<400x33xf32, #tpu.memory_space<vmem>>, %arg3: memref<1x400xf32, #tpu.memory_space<vmem>>, %arg4: memref<1x1xf32, #tpu.memory_space<vmem>>, %arg5: memref<1x128xf32, #tpu.memory_space<vmem>>) attributes {dimension_semantics = [#tpu.dimension_semantics<parallel>], iteration_bounds = array<i64: 1>, scalar_prefetch = 0 : i64, scratch_operands = 0 : i64, tpu.core_type = #tpu.core_type<tc>, window_params = [{transform_indices = @transform_0, window_bounds = array<i64: 128, 33>}, {pipeline_mode = #tpu.pipeline_mode<synchronous>, transform_indices = @transform_1, window_bounds = array<i64: 400, 33>}, {pipeline_mode = #tpu.pipeline_mode<synchronous>, transform_indices = @transform_2, window_bounds = array<i64: 1, 400>}, {pipeline_mode = #tpu.pipeline_mode<synchronous>, transform_indices = @transform_3, window_bounds = array<i64: 1, 1>}, {transform_indices = @transform_4, window_bounds = array<i64: 1, 128>}]} {
    %c0 = arith.constant 0 : index
    %c0_0 = arith.constant 0 : index
    %0 = vector.load %arg2[%c0, %c0_0] : memref<400x33xf32, #tpu.memory_space<vmem>>, vector<400x33xf32>
    %c0_1 = arith.constant 0 : index
    %c0_2 = arith.constant 0 : index
    %1 = vector.load %arg1[%c0_1, %c0_2] : memref<128x33xf32, #tpu.memory_space<vmem>>, vector<128x33xf32>
    %cst = arith.constant dense<0.000000e+00> : vector<400x128xf32>
    %2 = tpu.matmul %0, %1, %cst {dimension_numbers = #tpu.dot_dimension_numbers<[1], [1], [0], [0], [0, 0, 1, 0], [], []>} : vector<400x33xf32>, vector<128x33xf32>, vector<400x128xf32> -> vector<400x128xf32>
    %cst_3 = arith.constant 0.000000e+00 : f32
    %3 = vector.broadcast %cst_3 : f32 to vector<400x128xf32>
    %4 = arith.cmpf ogt, %2, %3 : vector<400x128xf32>
    %cst_4 = arith.constant 0.000000e+00 : f32
    %5 = vector.broadcast %cst_4 : f32 to vector<400x128xf32>
    %6 = arith.minimumf %2, %5 : vector<400x128xf32>
    %7 = math.exp %6 : vector<400x128xf32>
    %cst_5 = arith.constant 1.000000e+00 : f32
    %8 = vector.broadcast %cst_5 : f32 to vector<400x128xf32>
    %9 = arith.subf %7, %8 : vector<400x128xf32>
    %10 = arith.select %4, %2, %9 : vector<400x128xi1>, vector<400x128xf32>
    %c0_6 = arith.constant 0 : index
    %c0_7 = arith.constant 0 : index
    %11 = vector.load %arg3[%c0_6, %c0_7] : memref<1x400xf32, #tpu.memory_space<vmem>>, vector<1x400xf32>
    %cst_8 = arith.constant dense<0.000000e+00> : vector<1x128xf32>
    %12 = tpu.matmul %11, %10, %cst_8 {dimension_numbers = #tpu.dot_dimension_numbers<[1], [0], [0], [1], [0, 0, 1, 1], [], []>} : vector<1x400xf32>, vector<400x128xf32>, vector<1x128xf32> -> vector<1x128xf32>
    %c0_9 = arith.constant 0 : index
    %c0_10 = arith.constant 0 : index
    %13 = vector.load %arg4[%c0_9, %c0_10] : memref<1x1xf32, #tpu.memory_space<vmem>>, vector<1x1xf32>
    %14 = vector.broadcast %13 : vector<1x1xf32> to vector<1x128xf32>
    %15 = arith.addf %12, %14 : vector<1x128xf32>
    %c0_11 = arith.constant 0 : index
    %c0_12 = arith.constant 0 : index
    %16 = vector.load %arg5[%c0_11, %c0_12] : memref<1x128xf32, #tpu.memory_space<vmem>>, vector<1x128xf32>
    tpu.vector_store %arg5[%c0_11, %c0_12], %15 {strides = array<i32>} : memref<1x128xf32, #tpu.memory_space<vmem>>, vector<1x128xf32>,
    return
  }
  func.func @transform_0(%arg0: i32) -> (i32, i32) {
    %c0_i32 = arith.constant 0 : i32
    %c0_i32_0 = arith.constant 0 : i32
    return %arg0, %c0_i32 : i32, i32
  }
  func.func @transform_1(%arg0: i32) -> (i32, i32) {
    %c0_i32 = arith.constant 0 : i32
    %c0_i32_0 = arith.constant 0 : i32
    %c0_i32_1 = arith.constant 0 : i32
    return %c0_i32, %c0_i32_0 : i32, i32
  }
  func.func @transform_2(%arg0: i32) -> (i32, i32) {
    %c0_i32 = arith.constant 0 : i32
    %c0_i32_0 = arith.constant 0 : i32
    %c0_i32_1 = arith.constant 0 : i32
    return %c0_i32, %c0_i32_0 : i32, i32
  }
  func.func @transform_3(%arg0: i32) -> (i32, i32) {
    %c0_i32 = arith.constant 0 : i32
    %c0_i32_0 = arith.constant 0 : i32
    %c0_i32_1 = arith.constant 0 : i32
    return %c0_i32, %c0_i32_0 : i32, i32
  }
  func.func @transform_4(%arg0: i32) -> (i32, i32) {
    %c0_i32 = arith.constant 0 : i32
    %c0_i32_0 = arith.constant 0 : i32
    return %c0_i32, %arg0 : i32, i32
  }
}

</mosaic_0001>

<bundles_post_ra>
// kernel: tpu_custom_call.1
= control target key start
LH: loop header
LB: loop body
LE: loop exit
PB: predicated region body
PF: predicated region fallthrough
CT: control target
= control target key end

     0   :  { %s2294_s0 = inlined_call_operand.vmem [shape: f32[128,33], index: 0, kind: input, shape index: {}]   ;;  %s2295_s1 = inlined_call_operand.vmem [shape: f32[400,33], index: 1, kind: input, shape index: {}]   ;;  %s2296_s2 = inlined_call_operand.vmem [shape: f32[1,400], index: 2, kind: input, shape index: {}]   ;;  %s2297_s3 = inlined_call_operand.<no memory space> [shape: f32[1,1], index: 3, kind: input, shape index: {}]   ;;  %s2298_s4 = inlined_call_operand.hbm [shape: f32[1,128], index: 4, kind: output, shape index: {}]  }
   0x1   :  { %v9_v0 = vstv %s2297_s3 }
   0x2   :  { %10 = vst [vmem:[#allocation2] sm:$0x1] %v9_v0 }
   0x3   :  { %v70_v1 = vld [vmem:[%s2294_s0] sm:$0xff]  ;;  %v71_v2 = vld [vmem:[%s2294_s0 + $0x8] sm:$0xff]  ;;  %vm86_vm0 = vcmask 269312   ;;  %v72_v3 = vld [vmem:[%s2294_s0 + $0x10] sm:$0xff] }
   0x4   :  { %v1414_v4 = vpack.c.bf16 %v71_v2, %v70_v1  ;;  %vm1691_vm1 = vmpackc.low %vm86_vm0, %vm86_vm0  ;;  %v73_v6 = vld [vmem:[%s2294_s0 + $0x18] sm:$0xff]  ;;  %v20_v8 = vld [vmem:[%s2295_s1] sm:$0xff] }
   0x5   :  { %v1420_v7 = vpack.c.bf16 %v73_v6, %v72_v3  ;;  %v74_v9 = vld [vmem:[%s2294_s0 + $0x20] sm:$0xff]  ;;  %v75_v10 = vld [vmem:[%s2294_s0 + $0x28] sm:$0xff]  ;;  %1339 = vmatprep.mubr.msk.f32.mxu0 %vm86_vm0, %v20_v8  ;;  %v76_v12 = vld [vmem:[%s2294_s0 + $0x30] sm:$0xff] }
   0x6   :  { %1416 = vmatprep.subr.msk.bf16.mxu0 %vm1691_vm1, %v1414_v4  ;;  %v1426_v11 = vpack.c.bf16 %v75_v10, %v74_v9  ;;  %v77_v13 = vld [vmem:[%s2294_s0 + $0x38] sm:$0xff] }
   0x7   :  { %1419 = vmatpush3.bf16.xpose.msk.msra.mxu0 %vm1691_vm1, %v1414_v4  ;;  %v1432_v14 = vpack.c.bf16 %v77_v13, %v76_v12 }
   0x8   :  { %1422 = vmatprep.subr.msk.bf16.mxu0 %vm1691_vm1, %v1420_v7 }
   0xf   :  { %1425 = vmatpush3.bf16.xpose.msk.msra.mxu0 %vm1691_vm1, %v1420_v7 }
  0x10   :  { %1428 = vmatprep.subr.msk.bf16.mxu0 %vm1691_vm1, %v1426_v11 }
  0x17   :  { %1431 = vmatpush3.bf16.xpose.msk.msra.mxu0 %vm1691_vm1, %v1426_v11 }
  0x18   :  { %11 = vsyncpa [#allocation4], 0  ;;  %1434 = vmatprep.subr.msk.bf16.mxu0 %vm1691_vm1, %v1432_v14  ;;  %v78_v15 = vld [vmem:[%s2294_s0 + $0x40] sm:$0xff]  ;;  %v79_v16 = vld [vmem:[%s2294_s0 + $0x48] sm:$0xff]  ;;  %v907_v12 = vlaneseq }
  0x19   :  { %v1438_v17 = vpack.c.bf16 %v79_v16, %v78_v15  ;;  %v80_v18 = vld [vmem:[%s2294_s0 + $0x50] sm:$0xff]  ;;  %v81_v19 = vld [vmem:[%s2294_s0 + $0x58] sm:$0xff]  ;;  %v82_v21 = vld [vmem:[%s2294_s0 + $0x60] sm:$0xff] }
  0x1a   :  { %v1444_v20 = vpack.c.bf16 %v81_v19, %v80_v18  ;;  %v83_v22 = vld [vmem:[%s2294_s0 + $0x68] sm:$0xff]  ;;  %v84_v24 = vld [vmem:[%s2294_s0 + $0x70] sm:$0xff]  ;;  %v85_v25 = vld [vmem:[%s2294_s0 + $0x78] sm:$0xff]  ;;  %v1966_v13 = vshrl.u32 %v907_v12, 7 }
  0x1b   :  { %v1450_v23 = vpack.c.bf16 %v83_v22, %v82_v21  ;;  %v1456_v26 = vpack.c.bf16 %v85_v25, %v84_v24  ;;  %v21_v27 = vld [vmem:[%s2295_s1 + $0x8] sm:$0xff]  ;;  %v22_v28 = vld [vmem:[%s2295_s1 + $0x10] sm:$0xff]  ;;  %v23_v29 = vld [vmem:[%s2295_s1 + $0x18] sm:$0xff]  ;;  %v1649_v22 = vmov 0  }
  0x1c   :  { %v24_v30 = vld [vmem:[%s2295_s1 + $0x20] sm:$0xff]  ;;  %v25_v31 = vld [vmem:[%s2295_s1 + $0x28] sm:$0xff]  ;;  %v26_v32 = vld [vmem:[%s2295_s1 + $0x30] sm:$0xff]  ;;  %v922_v18 = vsub.s32 2, %v1966_v13  ;;  %1524 = vset.pattern.permute.xlu0 %v1649_v22 }
  0x1d   :  { %v27_v33 = vld [vmem:[%s2295_s1 + $0x38] sm:$0xff]  ;;  %v28_v34 = vld [vmem:[%s2295_s1 + $0x40] sm:$0xff]  ;;  %v29_v35 = vld [vmem:[%s2295_s1 + $0x48] sm:$0xff] }
  0x1e   :  { %v30_v36 = vld [vmem:[%s2295_s1 + $0x50] sm:$0xff]  ;;  %v31_v37 = vld [vmem:[%s2295_s1 + $0x58] sm:$0xff]  ;;  %v32_v38 = vld [vmem:[%s2295_s1 + $0x60] sm:$0xff] }
  0x1f   :  { %1437 = vmatpush3.bf16.xpose.msk.msra.mxu0 %vm1691_vm1, %v1432_v14  ;;  %v33_v39 = vld [vmem:[%s2295_s1 + $0x68] sm:$0xff]  ;;  %v34_v40 = vld [vmem:[%s2295_s1 + $0x70] sm:$0xff]  ;;  %v35_v41 = vld [vmem:[%s2295_s1 + $0x78] sm:$0xff]  ;;  %v918_v14 = vsub.s32 1, %v1966_v13 }
  0x20   :  { %1440 = vmatprep.subr.msk.bf16.mxu0 %vm1691_vm1, %v1438_v17  ;;  %v36_v42 = vld [vmem:[%s2295_s1 + $0x80] sm:$0xff]  ;;  %v37_v43 = vld [vmem:[%s2295_s1 + $0x88] sm:$0xff]  ;;  %v38_v44 = vld [vmem:[%s2295_s1 + $0x90] sm:$0xff] }
  0x21   :  { %v39_v45 = vld [vmem:[%s2295_s1 + $0x98] sm:$0xff]  ;;  %v40_v46 = vld [vmem:[%s2295_s1 + $0xa0] sm:$0xff]  ;;  %v41_v47 = vld [vmem:[%s2295_s1 + $0xa8] sm:$0xff] }
  0x22   :  { %v42_v48 = vld [vmem:[%s2295_s1 + $0xb0] sm:$0xff]  ;;  %v43_v49 = vld [vmem:[%s2295_s1 + $0xb8] sm:$0xff]  ;;  %v44_v50 = vld [vmem:[%s2295_s1 + $0xc0] sm:$0xff] }
  0x23   :  { %v45_v51 = vld [vmem:[%s2295_s1 + $0xc8] sm:$0xff]  ;;  %v46_v52 = vld [vmem:[%s2295_s1 + $0xd0] sm:$0xff]  ;;  %v47_v53 = vld [vmem:[%s2295_s1 + $0xd8] sm:$0xff] }
  0x24   :  { %v48_v54 = vld [vmem:[%s2295_s1 + $0xe0] sm:$0xff]  ;;  %v49_v55 = vld [vmem:[%s2295_s1 + $0xe8] sm:$0xff]  ;;  %v50_v56 = vld [vmem:[%s2295_s1 + $0xf0] sm:$0xff] }
  0x25   :  { %v51_v57 = vld [vmem:[%s2295_s1 + $0xf8] sm:$0xff]  ;;  %v52_v58 = vld [vmem:[%s2295_s1 + $0x100] sm:$0xff]  ;;  %v53_v59 = vld [vmem:[%s2295_s1 + $0x108] sm:$0xff] }
  0x26   :  { %v54_v60 = vld [vmem:[%s2295_s1 + $0x110] sm:$0xff]  ;;  %v55_v61 = vld [vmem:[%s2295_s1 + $0x118] sm:$0xff]  ;;  %v56_v62 = vld [vmem:[%s2295_s1 + $0x120] sm:$0xff] }
  0x27   :  { %1443 = vmatpush3.bf16.xpose.msk.msra.mxu0 %vm1691_vm1, %v1438_v17  ;;  %v57_v63 = vld [vmem:[%s2295_s1 + $0x128] sm:$0xff]  ;;  %v58_v0 = vld [vmem:[%s2295_s1 + $0x130] sm:$0xff]  ;;  %v59_v1 = vld [vmem:[%s2295_s1 + $0x138] sm:$0xff]  ;;  %v926_v17 = vsub.s32 3, %v1966_v13 }
  0x28   :  { %1446 = vmatprep.subr.msk.bf16.mxu0 %vm1691_vm1, %v1444_v20  ;;  %v60_v2 = vld [vmem:[%s2295_s1 + $0x140] sm:$0xff]  ;;  %v61_v3 = vld [vmem:[%s2295_s1 + $0x148] sm:$0xff]  ;;  %v62_v4 = vld [vmem:[%s2295_s1 + $0x150] sm:$0xff] }
  0x29   :  { %v63_v5 = vld [vmem:[%s2295_s1 + $0x158] sm:$0xff]  ;;  %v64_v6 = vld [vmem:[%s2295_s1 + $0x160] sm:$0xff]  ;;  %v65_v7 = vld [vmem:[%s2295_s1 + $0x168] sm:$0xff] }
  0x2a   :  { %v66_v8 = vld [vmem:[%s2295_s1 + $0x170] sm:$0xff]  ;;  %v67_v9 = vld [vmem:[%s2295_s1 + $0x178] sm:$0xff]  ;;  %v68_v10 = vld [vmem:[%s2295_s1 + $0x180] sm:$0xff] }
  0x2b   :  { %v69_v11 = vld [vmem:[%s2295_s1 + $0x188] sm:$0xff]  ;;  %v1972_v15 = vld [vmem:[%s2296_s2] sm:$0xf]  ;;  %s1651_s1 = smov [#allocation3]  }
  0x2c   :  { %v919_v16 = vrot.slane %v1972_v15, %v918_v14  ;;  %v1978_v19 = vrot.slane %v1972_v15, %v926_v17  ;;  %v901_v21 = vld [vmem:[#allocation2] sm:$0x1]  ;;  %s1081_s2 = sshll.u32 %s1651_s1, 4  ;;  %s1082_s2 = int_to_ptr.vmem [resolvable:$true] %s1081_s2 }
  0x2d   :  { %904 = vperm.xlu0 %1524, %v901_v21   ;;  %s1625_s12 = scalar_lea.vmem %s1082_s2, 16  ;;  %s1629_s13 = scalar_lea.vmem %s1082_s2, 32 }
  0x2e   :  { %998 = vmatprep.mubr.f32.mxu1 %v919_v16  ;;  %p1626_p0 = scmp.ne.s32.totalorder %s1082_s2, %s1625_s12  ;;  %p1630_p1 = scmp.lt.s32.totalorder %s1082_s2, %s1082_s2 }
  0x2f   :  { %1449 = vmatpush3.bf16.xpose.msk.msra.mxu0 %vm1691_vm1, %v1444_v20  ;;  %v1981_v20 = vrot.slane %v1972_v15, %v922_v18  ;;  %p1631_p2 = scmp.lt.s32.totalorder %s1629_s13, %s1625_s12 }
  0x30   :  { %1452 = vmatprep.subr.msk.bf16.mxu0 %vm1691_vm1, %v1450_v23 }
  0x31   :  { %p1632_p3 = por %p1631_p2, %p1630_p1 }
  0x33   :  { %p1633_p4 = pnand %p1632_p3, %p1626_p0 }
  0x37   :  { %1455 = vmatpush3.bf16.xpose.msk.msra.mxu0 %vm1691_vm1, %v1450_v23 }
  0x38   :  { %1458 = vmatprep.subr.msk.bf16.mxu0 %vm1691_vm1, %v1456_v26 }
  0x3f   :  { %1461 = vmatpush3.bf16.xpose.msk.msra.mxu0 %vm1691_vm1, %v1456_v26 }
  0x46   :  { %1340 = vmatmul.mubr.msk.f32.vlgmr.msra.gmra.mrb[0].mxu0 %vm86_vm0, %v21_v27 }
  0x47   :  { %1342 = vmatprep.mubr.msk.f32.mxu0 %vm86_vm0, %v22_v28 }
  0x4a   :  { %1343 = vmatmul.mubr.msk.f32.gmra.mrb[2].mxu0 %vm86_vm0, %v23_v29 }
  0x4b   :  { %1345 = vmatprep.mubr.msk.f32.mxu0 %vm86_vm0, %v24_v30 }
  0x4e   :  { %1346 = vmatmul.mubr.msk.f32.gmra.mrb[4].mxu0 %vm86_vm0, %v25_v31 }
  0x4f   :  { %1348 = vmatprep.mubr.msk.f32.mxu0 %vm86_vm0, %v26_v32 }
  0x52   :  { %1349 = vmatmul.mubr.msk.f32.gmra.mrb[6].mxu0 %vm86_vm0, %v27_v33 }
  0x53   :  { %1351 = vmatprep.mubr.msk.f32.mxu0 %vm86_vm0, %v28_v34 }
  0x56   :  { %1352 = vmatmul.mubr.msk.f32.gmra.mrb[8].mxu0 %vm86_vm0, %v29_v35 }
  0x57   :  { %1354 = vmatprep.mubr.msk.f32.mxu0 %vm86_vm0, %v30_v36 }
  0x5a   :  { %1355 = vmatmul.mubr.msk.f32.gmra.mrb[10].mxu0 %vm86_vm0, %v31_v37 }
  0x5b   :  { %1357 = vmatprep.mubr.msk.f32.mxu0 %vm86_vm0, %v32_v38 }
  0x5e   :  { %1358 = vmatmul.mubr.msk.f32.gmra.mrb[12].mxu0 %vm86_vm0, %v33_v39 }
  0x5f   :  { %1360 = vmatprep.mubr.msk.f32.mxu0 %vm86_vm0, %v34_v40 }
  0x62   :  { %1361 = vmatmul.mubr.msk.f32.gmra.mrb[14].mxu0 %vm86_vm0, %v35_v41 }
  0x63   :  { %1363 = vmatprep.mubr.msk.f32.mxu0 %vm86_vm0, %v36_v42 }
  0x66   :  { %1364 = vmatmul.mubr.msk.f32.gmra.mrb[16].mxu0 %vm86_vm0, %v37_v43 }
  0x67   :  { %1366 = vmatprep.mubr.msk.f32.mxu0 %vm86_vm0, %v38_v44 }
  0x6a   :  { %1367 = vmatmul.mubr.msk.f32.gmra.mrb[18].mxu0 %vm86_vm0, %v39_v45 }
  0x6b   :  { %1369 = vmatprep.mubr.msk.f32.mxu0 %vm86_vm0, %v40_v46 }
  0x6e   :  { %1370 = vmatmul.mubr.msk.f32.gmra.mrb[20].mxu0 %vm86_vm0, %v41_v47 }
  0x6f   :  { %1372 = vmatprep.mubr.msk.f32.mxu0 %vm86_vm0, %v42_v48 }
  0x72   :  { %1373 = vmatmul.mubr.msk.f32.gmra.mrb[22].mxu0 %vm86_vm0, %v43_v49 }
  0x73   :  { %1375 = vmatprep.mubr.msk.f32.mxu0 %vm86_vm0, %v44_v50 }
  0x76   :  { %1376 = vmatmul.mubr.msk.f32.gmra.mrb[24].mxu0 %vm86_vm0, %v45_v51 }
  0x77   :  { %1378 = vmatprep.mubr.msk.f32.mxu0 %vm86_vm0, %v46_v52 }
  0x7a   :  { %1379 = vmatmul.mubr.msk.f32.gmra.mrb[26].mxu0 %vm86_vm0, %v47_v53 }
  0x7b   :  { %1381 = vmatprep.mubr.msk.f32.mxu0 %vm86_vm0, %v48_v54 }
  0x7e   :  { %1382 = vmatmul.mubr.msk.f32.gmra.mrb[28].mxu0 %vm86_vm0, %v49_v55 }
  0x7f   :  { %1384 = vmatprep.mubr.msk.f32.mxu0 %vm86_vm0, %v50_v56 }
  0x82   :  { %1385 = vmatmul.mubr.msk.f32.gmra.mrb[30].mxu0 %vm86_vm0, %v51_v57 }
  0x83   :  { %1387 = vmatprep.mubr.msk.f32.mxu0 %vm86_vm0, %v52_v58 }
  0x86   :  { %1388 = vmatmul.mubr.msk.f32.gmra.mrb[32].mxu0 %vm86_vm0, %v53_v59 }
  0x87   :  { %1390 = vmatprep.mubr.msk.f32.mxu0 %vm86_vm0, %v54_v60 }
  0x8a   :  { %1391 = vmatmul.mubr.msk.f32.gmra.mrb[34].mxu0 %vm86_vm0, %v55_v61 }
  0x8b   :  { %1393 = vmatprep.mubr.msk.f32.mxu0 %vm86_vm0, %v56_v62 }
  0x8e   :  { %1394 = vmatmul.mubr.msk.f32.gmra.mrb[36].mxu0 %vm86_vm0, %v57_v63 }
  0x8f   :  { %1396 = vmatprep.mubr.msk.f32.mxu0 %vm86_vm0, %v58_v0 }
  0x92   :  { %1397 = vmatmul.mubr.msk.f32.gmra.mrb[38].mxu0 %vm86_vm0, %v59_v1 }
  0x93   :  { %1399 = vmatprep.mubr.msk.f32.mxu0 %vm86_vm0, %v60_v2 }
  0x96   :  { %1400 = vmatmul.mubr.msk.f32.gmra.mrb[40].mxu0 %vm86_vm0, %v61_v3 }
  0x97   :  { %1402 = vmatprep.mubr.msk.f32.mxu0 %vm86_vm0, %v62_v4 }
  0x9a   :  { %1403 = vmatmul.mubr.msk.f32.gmra.mrb[42].mxu0 %vm86_vm0, %v63_v5 }
  0x9b   :  { %1405 = vmatprep.mubr.msk.f32.mxu0 %vm86_vm0, %v64_v6 }
  0x9e   :  { %1406 = vmatmul.mubr.msk.f32.gmra.mrb[44].mxu0 %vm86_vm0, %v65_v7 }
  0x9f   :  { %1408 = vmatprep.mubr.msk.f32.mxu0 %vm86_vm0, %v66_v8 }
  0xa2   :  { %1409 = vmatmul.mubr.msk.f32.gmra.mrb[46].mxu0 %vm86_vm0, %v67_v9 }
  0xa3   :  { %1411 = vmatprep.mubr.msk.f32.mxu0 %vm86_vm0, %v68_v10 }
  0xa6   :  { %1412 = vmatmul.mubr.msk.f32.gmra.mrb[48].mxu0 %vm86_vm0, %v69_v11 }
 0x119   :  { %v1341_v23 = vpop.f32.mrb[0].mxu0 }
 0x11a   :  { %v651_v24 = vmin.f32 %v1341_v23, 0.0  ;;  %v351_v25 = vpop.f32.mrb[1].mxu0  ;;  %vm601_vm2 = vcmp.gt.f32.partialorder %v1341_v23, 0.0 }
 0x11b   :  { %v650_v26 = vmin.f32 %v351_v25, 0.0  ;;  %vm600_vm3 = vcmp.gt.f32.partialorder %v351_v25, 0.0 }
 0x11c   :  { %v702_v27 = vmul.f32 1.442695, %v651_v24 }
 0x11d   :  { %v700_v28 = vmul.f32 1.442695, %v650_v26  ;;  %v1344_v29 = vpop.f32.mrb[2].mxu0 }
 0x11e   :  { %1525 = vpow2.f32 %v702_v27  ;;  %v653_v30 = vmin.f32 %v1344_v29, 0.0  ;;  %v361_v31 = vpop.f32.mrb[3].mxu0  ;;  %vm603_vm4 = vcmp.gt.f32.partialorder %v1344_v29, 0.0 }
 0x11f   :  { %1527 = vpow2.f32 %v700_v28  ;;  %v652_v32 = vmin.f32 %v361_v31, 0.0  ;;  %vm602_vm5 = vcmp.gt.f32.partialorder %v361_v31, 0.0 }
 0x120   :  { %v706_v33 = vmul.f32 1.442695, %v653_v30 }
 0x121   :  { %v704_v34 = vmul.f32 1.442695, %v652_v32  ;;  %v1347_v35 = vpop.f32.mrb[4].mxu0 }
 0x122   :  { %1529 = vpow2.f32 %v706_v33  ;;  %v655_v36 = vmin.f32 %v1347_v35, 0.0  ;;  %v371_v37 = vpop.f32.mrb[5].mxu0  ;;  %vm605_vm6 = vcmp.gt.f32.partialorder %v1347_v35, 0.0 }
 0x123   :  { %1531 = vpow2.f32 %v704_v34  ;;  %v654_v38 = vmin.f32 %v371_v37, 0.0  ;;  %vm604_vm7 = vcmp.gt.f32.partialorder %v371_v37, 0.0 }
 0x124   :  { %v710_v39 = vmul.f32 1.442695, %v655_v36 }
 0x125   :  { %v708_v40 = vmul.f32 1.442695, %v654_v38  ;;  %v1983_v41 = vpop.f32.mrb[6].mxu0 }
 0x126   :  { %1533 = vpow2.f32 %v710_v39  ;;  %v657_v42 = vmin.f32 %v1983_v41, 0.0  ;;  %v1986_v43 = vpop.f32.mrb[7].mxu0  ;;  %vm607_vm8 = vcmp.gt.f32.partialorder %v1983_v41, 0.0 }
 0x127   :  { %1535 = vpow2.f32 %v708_v40  ;;  %v656_v44 = vmin.f32 %v1986_v43, 0.0  ;;  %vm606_vm9 = vcmp.gt.f32.partialorder %v1986_v43, 0.0 }
 0x128   :  { %v1526_v45 = vpop.eup %1525  ;;  %v714_v46 = vmul.f32 1.442695, %v657_v42 }
 0x129   :  { %v1528_v47 = vpop.eup %1527  ;;  %v712_v48 = vmul.f32 1.442695, %v656_v44  ;;  %v1989_v49 = vpop.f32.mrb[8].mxu0  ;;  %v1156_v50 = vadd.f32 -1.0, %v1526_v45 }
 0x12a   :  { %1537 = vpow2.f32 %v714_v46  ;;  %v659_v51 = vmin.f32 %v1989_v49, 0.0  ;;  %v1992_v52 = vpop.f32.mrb[9].mxu0  ;;  %v1155_v53 = vadd.f32 -1.0, %v1528_v47  ;;  %vm609_vm10 = vcmp.gt.f32.partialorder %v1989_v49, 0.0 }
 0x12b   :  { %1539 = vpow2.f32 %v712_v48  ;;  %v658_v54 = vmin.f32 %v1992_v52, 0.0  ;;  %v1995_v55 = vsel %vm601_vm2, %v1341_v23, %v1156_v50  ;;  %vm608_vm11 = vcmp.gt.f32.partialorder %v1992_v52, 0.0 }
 0x12c   :  { %v1530_v56 = vpop.eup %1529  ;;  %v718_v57 = vmul.f32 1.442695, %v659_v51  ;;  %v1997_v58 = vsel %vm600_vm3, %v351_v25, %v1155_v53 }
 0x12d   :  { %v1532_v59 = vpop.eup %1531  ;;  %v1158_v60 = vadd.f32 -1.0, %v1530_v56  ;;  %v716_v61 = vmul.f32 1.442695, %v658_v54  ;;  %v1999_v62 = vpop.f32.mrb[10].mxu0  ;;  %v1464_v63 = vpack.c.bf16 %v1995_v55, %v1997_v58 }
 0x12e   :  { %v1157_v0 = vadd.f32 -1.0, %v1532_v59  ;;  %1541 = vpow2.f32 %v718_v57  ;;  %v661_v1 = vmin.f32 %v1999_v62, 0.0  ;;  %v2004_v2 = vpop.f32.mrb[11].mxu0  ;;  %vm611_vm12 = vcmp.gt.f32.partialorder %v1999_v62, 0.0 }
 0x12f   :  { %v2006_v3 = vsel %vm603_vm4, %v1344_v29, %v1158_v60  ;;  %1543 = vpow2.f32 %v716_v61  ;;  %v660_v4 = vmin.f32 %v2004_v2, 0.0  ;;  %vm610_vm13 = vcmp.gt.f32.partialorder %v2004_v2, 0.0 }
 0x130   :  { %v1534_v5 = vpop.eup %1533  ;;  %v2009_v6 = vsel %vm602_vm5, %v361_v31, %v1157_v0  ;;  %v722_v7 = vmul.f32 1.442695, %v661_v1 }
 0x131   :  { %v1536_v8 = vpop.eup %1535  ;;  %v1160_v9 = vadd.f32 -1.0, %v1534_v5  ;;  %v720_v10 = vmul.f32 1.442695, %v660_v4  ;;  %v2011_v11 = vpop.f32.mrb[12].mxu0  ;;  %v1468_v12 = vpack.c.bf16 %v2006_v3, %v2009_v6 }
 0x132   :  { %v1159_v14 = vadd.f32 -1.0, %v1536_v8  ;;  %1545 = vpow2.f32 %v722_v7  ;;  %v663_v16 = vmin.f32 %v2011_v11, 0.0  ;;  %v2016_v17 = vpop.f32.mrb[13].mxu0  ;;  %vm613_vm14 = vcmp.gt.f32.partialorder %v2011_v11, 0.0 }
 0x133   :  { %v2018_v18 = vsel %vm605_vm6, %v1347_v35, %v1160_v9  ;;  %1547 = vpow2.f32 %v720_v10  ;;  %v662_v21 = vmin.f32 %v2016_v17, 0.0  ;;  %vm612_vm15 = vcmp.gt.f32.partialorder %v2016_v17, 0.0 }
 0x134   :  { %v1538_v22 = vpop.eup %1537  ;;  %v2021_v23 = vsel %vm604_vm7, %v371_v37, %v1159_v14  ;;  %v726_v24 = vmul.f32 1.442695, %v663_v16 }
 0x135   :  { %v1540_v25 = vpop.eup %1539  ;;  %v1162_v26 = vadd.f32 -1.0, %v1538_v22  ;;  %v724_v27 = vmul.f32 1.442695, %v662_v21  ;;  %v2023_v28 = vpop.f32.mrb[14].mxu0  ;;  %v1472_v29 = vpack.c.bf16 %v2018_v18, %v2021_v23 }
 0x136   :  { %v1161_v30 = vadd.f32 -1.0, %v1540_v25  ;;  %1549 = vpow2.f32 %v726_v24  ;;  %v665_v31 = vmin.f32 %v2023_v28, 0.0  ;;  %v2029_v32 = vpop.f32.mrb[15].mxu0  ;;  %vm615_vm0 = vcmp.gt.f32.partialorder %v2023_v28, 0.0 }
 0x137   :  { %v2032_v33 = vsel %vm607_vm8, %v1983_v41, %v1162_v26  ;;  %1551 = vpow2.f32 %v724_v27  ;;  %v664_v34 = vmin.f32 %v2029_v32, 0.0  ;;  %vm614_vm1 = vcmp.gt.f32.partialorder %v2029_v32, 0.0 }
 0x138   :  { %v1542_v35 = vpop.eup %1541  ;;  %v2037_v36 = vsel %vm606_vm9, %v1986_v43, %v1161_v30  ;;  %v730_v37 = vmul.f32 1.442695, %v665_v31 }
 0x139   :  { %v1544_v38 = vpop.eup %1543  ;;  %v1164_v39 = vadd.f32 -1.0, %v1542_v35  ;;  %v728_v40 = vmul.f32 1.442695, %v664_v34  ;;  %v2039_v42 = vpop.f32.mrb[16].mxu0  ;;  %v1476_v44 = vpack.c.bf16 %v2032_v33, %v2037_v36 }
 0x13a   :  { %v1163_v41 = vadd.f32 -1.0, %v1544_v38  ;;  %1553 = vpow2.f32 %v730_v37  ;;  %v667_v45 = vmin.f32 %v2039_v42, 0.0  ;;  %v2045_v46 = vpop.f32.mrb[17].mxu0  ;;  %vm617_vm2 = vcmp.gt.f32.partialorder %v2039_v42, 0.0 }
 0x13b   :  { %v2048_v43 = vsel %vm609_vm10, %v1989_v49, %v1164_v39  ;;  %1555 = vpow2.f32 %v728_v40  ;;  %v666_v47 = vmin.f32 %v2045_v46, 0.0  ;;  %vm616_vm3 = vcmp.gt.f32.partialorder %v2045_v46, 0.0 }
 0x13c   :  { %v1546_v48 = vpop.eup %1545  ;;  %v2053_v50 = vsel %vm608_vm11, %v1992_v52, %v1163_v41  ;;  %v734_v51 = vmul.f32 1.442695, %v667_v45 }
 0x13d   :  { %v1548_v53 = vpop.eup %1547  ;;  %v1166_v54 = vadd.f32 -1.0, %v1546_v48  ;;  %v732_v56 = vmul.f32 1.442695, %v666_v47  ;;  %v2055_v57 = vpop.f32.mrb[18].mxu0  ;;  %v1480_v59 = vpack.c.bf16 %v2048_v43, %v2053_v50 }
 0x13e   :  { %v1165_v49 = vadd.f32 -1.0, %v1548_v53  ;;  %1557 = vpow2.f32 %v734_v51  ;;  %v669_v60 = vmin.f32 %v2055_v57, 0.0  ;;  %v2061_v61 = vpop.f32.mrb[19].mxu0  ;;  %vm619_vm4 = vcmp.gt.f32.partialorder %v2055_v57, 0.0 }
 0x13f   :  { %v2064_v52 = vsel %vm611_vm12, %v1999_v62, %v1166_v54  ;;  %1559 = vpow2.f32 %v732_v56  ;;  %v668_v0 = vmin.f32 %v2061_v61, 0.0  ;;  %vm618_vm5 = vcmp.gt.f32.partialorder %v2061_v61, 0.0 }
 0x140   :  { %v1550_v1 = vpop.eup %1549  ;;  %v2069_v4 = vsel %vm610_vm13, %v2004_v2, %v1165_v49  ;;  %v738_v5 = vmul.f32 1.442695, %v669_v60 }
 0x141   :  { %v1552_v7 = vpop.eup %1551  ;;  %v1168_v8 = vadd.f32 -1.0, %v1550_v1  ;;  %v736_v9 = vmul.f32 1.442695, %v668_v0  ;;  %v2071_v10 = vpop.f32.mrb[20].mxu0  ;;  %v1484_v14 = vpack.c.bf16 %v2064_v52, %v2069_v4 }
 0x142   :  { %v1167_v62 = vadd.f32 -1.0, %v1552_v7  ;;  %1561 = vpow2.f32 %v738_v5  ;;  %v671_v16 = vmin.f32 %v2071_v10, 0.0  ;;  %v2077_v21 = vpop.f32.mrb[21].mxu0  ;;  %vm621_vm6 = vcmp.gt.f32.partialorder %v2071_v10, 0.0 }
 0x143   :  { %v2080_v2 = vsel %vm613_vm14, %v2011_v11, %v1168_v8  ;;  %1563 = vpow2.f32 %v736_v9  ;;  %v670_v22 = vmin.f32 %v2077_v21, 0.0  ;;  %vm620_vm7 = vcmp.gt.f32.partialorder %v2077_v21, 0.0 }
 0x144   :  { %v1554_v24 = vpop.eup %1553  ;;  %v2085_v25 = vsel %vm612_vm15, %v2016_v17, %v1167_v62  ;;  %v742_v26 = vmul.f32 1.442695, %v671_v16 }
 0x145   :  { %v1556_v27 = vpop.eup %1555  ;;  %v1170_v30 = vadd.f32 -1.0, %v1554_v24  ;;  %v740_v31 = vmul.f32 1.442695, %v670_v22  ;;  %v2087_v34 = vpop.f32.mrb[22].mxu0  ;;  %v1488_v35 = vpack.c.bf16 %v2080_v2, %v2085_v25 }
 0x146   :  { %v1169_v11 = vadd.f32 -1.0, %v1556_v27  ;;  %1565 = vpow2.f32 %v742_v26  ;;  %v673_v37 = vmin.f32 %v2087_v34, 0.0  ;;  %v2093_v38 = vpop.f32.mrb[23].mxu0  ;;  %vm623_vm8 = vcmp.gt.f32.partialorder %v2087_v34, 0.0 }
 0x147   :  { %v2096_v17 = vsel %vm615_vm0, %v2023_v28, %v1170_v30  ;;  %1567 = vpow2.f32 %v740_v31  ;;  %v672_v39 = vmin.f32 %v2093_v38, 0.0  ;;  %vm622_vm9 = vcmp.gt.f32.partialorder %v2093_v38, 0.0 }
 0x148   :  { %v1558_v40 = vpop.eup %1557  ;;  %v2101_v41 = vsel %vm614_vm1, %v2029_v32, %v1169_v11  ;;  %v746_v45 = vmul.f32 1.442695, %v673_v37 }
 0x149   :  { %v1560_v47 = vpop.eup %1559  ;;  %v744_v48 = vmul.f32 1.442695, %v672_v39  ;;  %v2103_v51 = vpop.f32.mrb[24].mxu0  ;;  %v1172_v53 = vadd.f32 -1.0, %v1558_v40  ;;  %v1492_v54 = vpack.c.bf16 %v2096_v17, %v2101_v41 }
 0x14a   :  { %1569 = vpow2.f32 %v746_v45  ;;  %v675_v28 = vmin.f32 %v2103_v51, 0.0  ;;  %v2108_v56 = vpop.f32.mrb[25].mxu0  ;;  %v1171_v49 = vadd.f32 -1.0, %v1560_v47  ;;  %vm625_vm10 = vcmp.gt.f32.partialorder %v2103_v51, 0.0 }
 0x14b   :  { %1571 = vpow2.f32 %v744_v48  ;;  %v674_v32 = vmin.f32 %v2108_v56, 0.0  ;;  %v867_v60 = vsel %vm617_vm2, %v2039_v42, %v1172_v53  ;;  %vm624_vm11 = vcmp.gt.f32.partialorder %v2108_v56, 0.0 }
 0x14c   :  { %v1562_v0 = vpop.eup %1561  ;;  %v750_v1 = vmul.f32 1.442695, %v675_v28  ;;  %v866_v5 = vsel %vm616_vm3, %v2045_v46, %v1171_v49 }
 0x14d   :  { %v1564_v7 = vpop.eup %1563  ;;  %v1174_v8 = vadd.f32 -1.0, %v1562_v0  ;;  %v748_v9 = vmul.f32 1.442695, %v674_v32  ;;  %v2115_v62 = vpop.f32.mrb[26].mxu0  ;;  %v1462_v16 = vpack.c.bf16 %v867_v60, %v866_v5 }
 0x14e   :  { %v1173_v22 = vadd.f32 -1.0, %v1564_v7  ;;  %1573 = vpow2.f32 %v750_v1  ;;  %v677_v24 = vmin.f32 %v2115_v62, 0.0  ;;  %v2119_v26 = vpop.f32.mrb[27].mxu0  ;;  %vm627_vm12 = vcmp.gt.f32.partialorder %v2115_v62, 0.0 }
 0x14f   :  { %v869_v42 = vsel %vm619_vm4, %v2055_v57, %v1174_v8  ;;  %1575 = vpow2.f32 %v748_v9  ;;  %v676_v46 = vmin.f32 %v2119_v26, 0.0  ;;  %1463 = vmatprep.subr.bf16.mxu1 %v1462_v16  ;;  %vm626_vm13 = vcmp.gt.f32.partialorder %v2119_v26, 0.0 }
 0x150   :  { %v1566_v27 = vpop.eup %1565  ;;  %v868_v30 = vsel %vm618_vm5, %v2061_v61, %v1173_v22  ;;  %v754_v31 = vmul.f32 1.442695, %v677_v24  ;;  %1465 = vmatpush3.bf16.msra.mxu1 %v1464_v63  ;;  %vm931_vm4 = vcmask 130048  }
 0x151   :  { %v1568_v11 = vpop.eup %1567  ;;  %v1176_v37 = vadd.f32 -1.0, %v1566_v27  ;;  %v752_v39 = vmul.f32 1.442695, %v676_v46  ;;  %v2128_v40 = vpop.f32.mrb[28].mxu0  ;;  %v1466_v57 = vpack.c.bf16 %v869_v42, %v868_v30 }
 0x152   :  { %v1175_v45 = vadd.f32 -1.0, %v1568_v11  ;;  %1577 = vpow2.f32 %v754_v31  ;;  %v679_v47 = vmin.f32 %v2128_v40, 0.0  ;;  %v2132_v48 = vpop.f32.mrb[29].mxu0  ;;  %vm629_vm14 = vcmp.gt.f32.partialorder %v2128_v40, 0.0 }
 0x153   :  { %v871_v61 = vsel %vm621_vm6, %v2071_v10, %v1176_v37  ;;  %1579 = vpow2.f32 %v752_v39  ;;  %v678_v55 = vmin.f32 %v2132_v48, 0.0  ;;  %1467 = vmatprep.subr.bf16.mxu1 %v1466_v57  ;;  %vm628_vm15 = vcmp.gt.f32.partialorder %v2132_v48, 0.0 }
 0x154   :  { %v1570_v58 = vpop.eup %1569  ;;  %v870_v63 = vsel %vm620_vm7, %v2077_v21, %v1175_v45  ;;  %v758_v53 = vmul.f32 1.442695, %v679_v47  ;;  %1469 = vmatpush3.bf16.msra.mxu1 %v1468_v12 }
 0x155   :  { %v1572_v28 = vpop.eup %1571  ;;  %v1178_v49 = vadd.f32 -1.0, %v1570_v58  ;;  %v756_v32 = vmul.f32 1.442695, %v678_v55  ;;  %v2141_v60 = vpop.f32.mrb[30].mxu0  ;;  %v1470_v10 = vpack.c.bf16 %v871_v61, %v870_v63 }
 0x156   :  { %v1177_v0 = vadd.f32 -1.0, %v1572_v28  ;;  %1581 = vpow2.f32 %v758_v53  ;;  %v681_v1 = vmin.f32 %v2141_v60, 0.0  ;;  %v2145_v5 = vpop.f32.mrb[31].mxu0  ;;  %vm631_vm0 = vcmp.gt.f32.partialorder %v2141_v60, 0.0 }
 0x157   :  { %v873_v21 = vsel %vm623_vm8, %v2087_v34, %v1178_v49  ;;  %1583 = vpow2.f32 %v756_v32  ;;  %v680_v3 = vmin.f32 %v2145_v5, 0.0  ;;  %1471 = vmatprep.subr.bf16.mxu1 %v1470_v10  ;;  %v909_v10 = vsub.s32 0, %v1966_v13 }
 0x158   :  { %v1574_v6 = vpop.eup %1573  ;;  %v872_v12 = vsel %vm622_vm9, %v2093_v38, %v1177_v0  ;;  %v762_v7 = vmul.f32 1.442695, %v681_v1  ;;  %1473 = vmatpush3.bf16.msra.mxu1 %v1472_v29  ;;  %vm630_vm1 = vcmp.gt.f32.partialorder %v2145_v5, 0.0 }
 0x159   :  { %v1576_v8 = vpop.eup %1575  ;;  %v1180_v9 = vadd.f32 -1.0, %v1574_v6  ;;  %v760_v16 = vmul.f32 1.442695, %v680_v3  ;;  %v2154_v22 = vpop.f32.mrb[32].mxu0  ;;  %v1474_v34 = vpack.c.bf16 %v873_v21, %v872_v12 }
 0x15a   :  { %v1179_v24 = vadd.f32 -1.0, %v1576_v8  ;;  %1585 = vpow2.f32 %v762_v7  ;;  %v683_v42 = vmin.f32 %v2154_v22, 0.0  ;;  %v2158_v46 = vpop.f32.mrb[33].mxu0  ;;  %vm633_vm2 = vcmp.gt.f32.partialorder %v2154_v22, 0.0 }
 0x15b   :  { %v875_v38 = vsel %vm625_vm10, %v2103_v51, %v1180_v9  ;;  %1587 = vpow2.f32 %v760_v16  ;;  %v682_v18 = vmin.f32 %v2158_v46, 0.0  ;;  %1475 = vmatprep.subr.bf16.mxu1 %v1474_v34  ;;  %v915_v9 = vrot.slane %v1972_v15, %v909_v10 }
 0x15c   :  { %v1578_v23 = vpop.eup %1577  ;;  %v874_v29 = vsel %vm624_vm11, %v2108_v56, %v1179_v24  ;;  %v766_v27 = vmul.f32 1.442695, %v683_v42  ;;  %1477 = vmatpush3.bf16.msra.mxu1 %v1476_v44  ;;  %vm632_vm3 = vcmp.gt.f32.partialorder %v2158_v46, 0.0 }
 0x15d   :  { %v1580_v30 = vpop.eup %1579  ;;  %v1182_v31 = vadd.f32 -1.0, %v1578_v23  ;;  %v764_v11 = vmul.f32 1.442695, %v682_v18  ;;  %v2167_v37 = vpop.f32.mrb[34].mxu0  ;;  %v1478_v51 = vpack.c.bf16 %v875_v38, %v874_v29 }
 0x15e   :  { %v1181_v39 = vadd.f32 -1.0, %v1580_v30  ;;  %1589 = vpow2.f32 %v766_v27  ;;  %v685_v57 = vmin.f32 %v2167_v37, 0.0  ;;  %v2171_v45 = vpop.f32.mrb[35].mxu0  ;;  %vm635_vm5 = vcmp.gt.f32.partialorder %v2167_v37, 0.0 }
 0x15f   :  { %v877_v56 = vsel %vm627_vm12, %v2115_v62, %v1182_v31  ;;  %1591 = vpow2.f32 %v764_v11  ;;  %v684_v33 = vmin.f32 %v2171_v45, 0.0  ;;  %1479 = vmatprep.subr.bf16.mxu1 %v1478_v51  ;;  %vm634_vm6 = vcmp.gt.f32.partialorder %v2171_v45, 0.0 }
 0x160   :  { %v1582_v36 = vpop.eup %1581  ;;  %v876_v44 = vsel %vm626_vm13, %v2119_v26, %v1181_v39  ;;  %v770_v47 = vmul.f32 1.442695, %v685_v57  ;;  %1481 = vmatpush3.bf16.msra.mxu1 %v1480_v59 }
 0x161   :  { %v1584_v61 = vpop.eup %1583  ;;  %v1184_v55 = vadd.f32 -1.0, %v1582_v36  ;;  %v768_v58 = vmul.f32 1.442695, %v684_v33  ;;  %v2180_v63 = vpop.f32.mrb[36].mxu0  ;;  %v1482_v62 = vpack.c.bf16 %v877_v56, %v876_v44 }
 0x162   :  { %v1183_v53 = vadd.f32 -1.0, %v1584_v61  ;;  %1593 = vpow2.f32 %v770_v47  ;;  %v687_v28 = vmin.f32 %v2180_v63, 0.0  ;;  %v2184_v49 = vpop.f32.mrb[37].mxu0  ;;  %vm637_vm7 = vcmp.gt.f32.partialorder %v2180_v63, 0.0 }
 0x163   :  { %v879_v26 = vsel %vm629_vm14, %v2128_v40, %v1184_v55  ;;  %1595 = vpow2.f32 %v768_v58  ;;  %v686_v43 = vmin.f32 %v2184_v49, 0.0  ;;  %1483 = vmatprep.subr.bf16.mxu1 %v1482_v62  ;;  %vm636_vm8 = vcmp.gt.f32.partialorder %v2184_v49, 0.0 }
 0x164   :  { %v1586_v50 = vpop.eup %1585  ;;  %v878_v59 = vsel %vm628_vm15, %v2132_v48, %v1183_v53  ;;  %v774_v32 = vmul.f32 1.442695, %v687_v28  ;;  %1485 = vmatpush3.bf16.msra.mxu1 %v1484_v14 }
 0x165   :  { %v1588_v0 = vpop.eup %1587  ;;  %v1186_v1 = vadd.f32 -1.0, %v1586_v50  ;;  %v772_v21 = vmul.f32 1.442695, %v686_v43  ;;  %v2194_v40 = vpop.f32.mrb[38].mxu0  ;;  %v1486_v3 = vpack.c.bf16 %v879_v26, %v878_v59 }
 0x166   :  { %v1185_v6 = vadd.f32 -1.0, %v1588_v0  ;;  %1597 = vpow2.f32 %v774_v32  ;;  %v689_v12 = vmin.f32 %v2194_v40, 0.0  ;;  %v2198_v48 = vpop.f32.mrb[39].mxu0  ;;  %vm639_vm9 = vcmp.gt.f32.partialorder %v2194_v40, 0.0 }
 0x167   :  { %v881_v7 = vsel %vm631_vm0, %v2141_v60, %v1186_v1  ;;  %1599 = vpow2.f32 %v772_v21  ;;  %v688_v52 = vmin.f32 %v2198_v48, 0.0  ;;  %1487 = vmatprep.subr.bf16.mxu1 %v1486_v3  ;;  %vm638_vm10 = vcmp.gt.f32.partialorder %v2198_v48, 0.0 }
 0x168   :  { %v1590_v4 = vpop.eup %1589  ;;  %v880_v14 = vsel %vm630_vm1, %v2145_v5, %v1185_v6  ;;  %v778_v8 = vmul.f32 1.442695, %v689_v12  ;;  %1489 = vmatpush3.bf16.msra.mxu1 %v1488_v35 }
 0x169   :  { %v1592_v16 = vpop.eup %1591  ;;  %v1188_v60 = vadd.f32 -1.0, %v1590_v4  ;;  %v776_v34 = vmul.f32 1.442695, %v688_v52  ;;  %v2210_v24 = vpop.f32.mrb[40].mxu0  ;;  %v1490_v42 = vpack.c.bf16 %v881_v7, %v880_v14 }
 0x16a   :  { %v1187_v38 = vadd.f32 -1.0, %v1592_v16  ;;  %1601 = vpow2.f32 %v778_v8  ;;  %v691_v5 = vmin.f32 %v2210_v24, 0.0  ;;  %v2214_v18 = vpop.f32.mrb[41].mxu0  ;;  %vm641_vm11 = vcmp.gt.f32.partialorder %v2210_v24, 0.0 }
 0x16b   :  { %v883_v2 = vsel %vm633_vm2, %v2154_v22, %v1188_v60  ;;  %1603 = vpow2.f32 %v776_v34  ;;  %v690_v15 = vmin.f32 %v2214_v18, 0.0  ;;  %1491 = vmatprep.subr.bf16.mxu1 %v1490_v42  ;;  %v1650_v22 = vmov 0.0|0.0  }
 0x16c   :  { %v1594_v25 = vpop.eup %1593  ;;  %v882_v35 = vsel %vm632_vm3, %v2158_v46, %v1187_v38  ;;  %v782_v23 = vmul.f32 1.442695, %v691_v5  ;;  %1493 = vmatpush3.bf16.msra.mxu1 %v1492_v54  ;;  %vm640_vm12 = vcmp.gt.f32.partialorder %v2214_v18, 0.0 }
 0x16d   :  { %v1596_v29 = vpop.eup %1595  ;;  %v1495_v27 = vpack.c.bf16 %v883_v2, %v882_v35  ;;  %v1190_v30 = vadd.f32 -1.0, %v1594_v25  ;;  %v780_v31 = vmul.f32 1.442695, %v690_v15  ;;  %v2223_v11 = vpop.f32.mrb[42].mxu0  ;;  %1494 = vmatprep.subr.bf16.mxu1 %v1650_v22 }
 0x16e   :  { %v1189_v51 = vadd.f32 -1.0, %v1596_v29  ;;  %1605 = vpow2.f32 %v782_v23  ;;  %v693_v46 = vmin.f32 %v2223_v11, 0.0  ;;  %v2228_v39 = vpop.f32.mrb[43].mxu0  ;;  %vm643_vm13 = vcmp.gt.f32.partialorder %v2223_v11, 0.0 }
 0x16f   :  { %v885_v17 = vsel %vm635_vm5, %v2167_v37, %v1190_v30  ;;  %1607 = vpow2.f32 %v780_v31  ;;  %v692_v41 = vmin.f32 %v2228_v39, 0.0  ;;  %999 = vmatmul.mubr.f32.vlgmr.msra.gmra.mrb[0].mxu1 %v915_v9  ;;  %vm642_vm14 = vcmp.gt.f32.partialorder %v2228_v39, 0.0 }
 0x170   :  { %v1598_v54 = vpop.eup %1597  ;;  %v884_v57 = vsel %vm634_vm6, %v2171_v45, %v1189_v51  ;;  %v786_v56 = vmul.f32 1.442695, %v693_v46  ;;  %1496 = vmatpush1.bf16.msra.mxu1 %v1495_v27  ;;  %1205 = vmatprep.mubr.msk.f32.mxu1 %vm931_vm4, %v1978_v19 }
 0x171   :  { %v1600_v33 = vpop.eup %1599  ;;  %v1498_v36 = vpack.c.bf16 %v885_v17, %v884_v57  ;;  %v1192_v44 = vadd.f32 -1.0, %v1598_v54  ;;  %v784_v47 = vmul.f32 1.442695, %v692_v41  ;;  %v2235_v61 = vpop.f32.mrb[44].mxu0  ;;  %1497 = vmatprep.subr.bf16.mxu1 %v1650_v22 }
 0x172   :  { %v1191_v37 = vadd.f32 -1.0, %v1600_v33  ;;  %1609 = vpow2.f32 %v786_v56  ;;  %v695_v55 = vmin.f32 %v2235_v61, 0.0  ;;  %v2240_v58 = vpop.f32.mrb[45].mxu0  ;;  %vm645_vm15 = vcmp.gt.f32.partialorder %v2235_v61, 0.0 }
 0x173   :  { %v887_v45 = vsel %vm637_vm7, %v2180_v63, %v1192_v44  ;;  %1611 = vpow2.f32 %v784_v47  ;;  %v694_v19 = vmin.f32 %v2240_v58, 0.0  ;;  %vm644_vm0 = vcmp.gt.f32.partialorder %v2240_v58, 0.0 }
 0x174   :  { %v1602_v62 = vpop.eup %1601  ;;  %v886_v53 = vsel %vm636_vm8, %v2184_v49, %v1191_v37  ;;  %v790_v28 = vmul.f32 1.442695, %v695_v55  ;;  %1499 = vmatpush1.bf16.msra.mxu1 %v1498_v36 }
 0x175   :  { %v1604_v26 = vpop.eup %1603  ;;  %v1501_v43 = vpack.c.bf16 %v887_v45, %v886_v53  ;;  %v1194_v50 = vadd.f32 -1.0, %v1602_v62  ;;  %v788_v59 = vmul.f32 1.442695, %v694_v19  ;;  %v2246_v32 = vpop.f32.mrb[46].mxu0  ;;  %1500 = vmatprep.subr.bf16.mxu1 %v1650_v22 }
 0x176   :  { %v1193_v63 = vadd.f32 -1.0, %v1604_v26  ;;  %1613 = vpow2.f32 %v790_v28  ;;  %v697_v0 = vmin.f32 %v2246_v32, 0.0  ;;  %v2251_v1 = vpop.f32.mrb[47].mxu0  ;;  %vm647_vm1 = vcmp.gt.f32.partialorder %v2246_v32, 0.0  ;;  %v905_v53 = vpop.permute.xlu0 %904 }
 0x177   :  { %v889_v49 = vsel %vm639_vm9, %v2194_v40, %v1194_v50  ;;  %1615 = vpow2.f32 %v788_v59  ;;  %v696_v21 = vmin.f32 %v2251_v1, 0.0  ;;  %vm646_vm2 = vcmp.gt.f32.partialorder %v2251_v1, 0.0 }
 0x178   :  { %v1606_v3 = vpop.eup %1605  ;;  %v888_v6 = vsel %vm638_vm10, %v2198_v48, %v1193_v63  ;;  %v794_v12 = vmul.f32 1.442695, %v697_v0  ;;  %1502 = vmatpush1.bf16.msra.mxu1 %v1501_v43  ;;  %v910_v28 = vrot.slane %v905_v53, %v909_v10 }
 0x179   :  { %v1608_v7 = vpop.eup %1607  ;;  %v1504_v52 = vpack.c.bf16 %v889_v49, %v888_v6  ;;  %v1196_v4 = vadd.f32 -1.0, %v1606_v3  ;;  %v792_v14 = vmul.f32 1.442695, %v696_v21  ;;  %v1413_v8 = vpop.f32.mrb[48].mxu0  ;;  %1503 = vmatprep.subr.bf16.mxu1 %v1650_v22 }
 0x17a   :  { %v1195_v40 = vadd.f32 -1.0, %v1608_v7  ;;  %1617 = vpow2.f32 %v794_v12  ;;  %v699_v9 = vmin.f32 %v1413_v8, 0.0  ;;  %v591_v16 = vpop.f32.mrb[49].mxu0  ;;  %vm649_vm3 = vcmp.gt.f32.partialorder %v1413_v8, 0.0 }
 0x17b   :  { %v891_v60 = vsel %vm641_vm11, %v2210_v24, %v1196_v4  ;;  %1619 = vpow2.f32 %v792_v14  ;;  %v698_v48 = vmin.f32 %v591_v16, 0.0  ;;  %vm648_vm4 = vcmp.gt.f32.partialorder %v591_v16, 0.0 }
 0x17c   :  { %v1610_v34 = vpop.eup %1609  ;;  %v890_v42 = vsel %vm640_vm12, %v2214_v18, %v1195_v40  ;;  %v798_v38 = vmul.f32 1.442695, %v699_v9  ;;  %1505 = vmatpush1.bf16.msra.mxu1 %v1504_v52 }
 0x17d   :  { %v1612_v5 = vpop.eup %1611  ;;  %v1507_v2 = vpack.c.bf16 %v891_v60, %v890_v42  ;;  %v1198_v15 = vadd.f32 -1.0, %v1610_v34  ;;  %v796_v25 = vmul.f32 1.442695, %v698_v48  ;;  %1506 = vmatprep.subr.bf16.mxu1 %v1650_v22 }
 0x17e   :  { %v1197_v35 = vadd.f32 -1.0, %v1612_v5  ;;  %1621 = vpow2.f32 %v798_v38 }
 0x17f   :  { %v893_v24 = vsel %vm643_vm13, %v2223_v11, %v1198_v15  ;;  %1623 = vpow2.f32 %v796_v25 }
 0x180   :  { %v1614_v23 = vpop.eup %1613  ;;  %v892_v18 = vsel %vm642_vm14, %v2228_v39, %v1197_v35  ;;  %1508 = vmatpush1.bf16.msra.mxu1 %v1507_v2 }
 0x181   :  { %v1616_v29 = vpop.eup %1615  ;;  %v1510_v27 = vpack.c.bf16 %v893_v24, %v892_v18  ;;  %v1200_v30 = vadd.f32 -1.0, %v1614_v23  ;;  %1509 = vmatprep.subr.bf16.mxu1 %v1650_v22 }
 0x182   :  { %v1199_v31 = vadd.f32 -1.0, %v1616_v29 }
 0x183   :  { %v895_v51 = vsel %vm645_vm15, %v2235_v61, %v1200_v30 }
 0x184   :  { %v1618_v11 = vpop.eup %1617  ;;  %v894_v46 = vsel %vm644_vm0, %v2240_v58, %v1199_v31  ;;  %1511 = vmatpush1.bf16.msra.mxu1 %v1510_v27 }
 0x185   :  { %v1620_v17 = vpop.eup %1619  ;;  %v1513_v41 = vpack.c.bf16 %v895_v51, %v894_v46  ;;  %v1202_v39 = vadd.f32 -1.0, %v1618_v11  ;;  %1512 = vmatprep.subr.bf16.mxu1 %v1650_v22 }
 0x186   :  { %v1201_v54 = vadd.f32 -1.0, %v1620_v17 }
 0x187   :  { %v897_v57 = vsel %vm647_vm1, %v2246_v32, %v1202_v39 }
 0x188   :  { %v1622_v56 = vpop.eup %1621  ;;  %v896_v33 = vsel %vm646_vm2, %v2251_v1, %v1201_v54  ;;  %1514 = vmatpush1.bf16.msra.mxu1 %v1513_v41 }
 0x189   :  { %v1624_v36 = vpop.eup %1623  ;;  %v1516_v44 = vpack.c.bf16 %v897_v57, %v896_v33  ;;  %v1204_v47 = vadd.f32 -1.0, %v1622_v56  ;;  %1515 = vmatprep.subr.bf16.mxu1 %v1650_v22 }
 0x18a   :  { %v1203_v61 = vadd.f32 -1.0, %v1624_v36 }
 0x18b   :  { %v899_v37 = vsel %vm649_vm3, %v1413_v8, %v1204_v47 }
 0x18c   :  { %v898_v55 = vsel %vm648_vm4, %v591_v16, %v1203_v61  ;;  %1517 = vmatpush1.bf16.msra.mxu1 %v1516_v44 }
 0x18d   :  { %v1519_v58 = vpack.c.bf16 %v899_v37, %v898_v55  ;;  %1518 = vmatprep.subr.bf16.mxu1 %v1650_v22 }
 0x190   :  { %1520 = vmatpush1.bf16.msra.mxu1 %v1519_v58 }
 0x193   :  { %1069 = vmatmul.mubr.f32.vlgmr.msra.gmra.mrb[2].mxu1 %v1981_v20 }
 0x242   :  { %v1304_v45 = vpop.f32.mrb[0].mxu1 }
 0x243   :  { %v1305_v19 = vpop.f32.mrb[1].mxu1 }
 0x244   :  { %v1306_v62 = vadd.f32 %v1305_v19, %v1304_v45 }
 0x246   :  { %v1001_v26 = vadd.f32 %v1306_v62, %v910_v28 }
 0x266   :  { %v1070_v43 = vpop.f32.mrb[2].mxu1 }
 0x267   :  { %v1071_v50 = vadd.f32 %v1070_v43, %v1001_v26  ;;  %v1072_v59 = vpop.f32.mrb[3].mxu1 }
 0x269   :  { %1074 = vst [vmem:[#allocation3] sm:$0x1] %v1071_v50 }
 0x26a   :  { %1636 = shalt.err (!%p1633_p4)
}
 0x26b   :  { %s1637_s16 = scalar_lea.hbm %s2298_s4, 16 }
 0x26c   :  { %p1638_p5 = scmp.ne.s32.totalorder %s2298_s4, %s1637_s16  ;;  %p1641_p6 = scmp.lt.u32.totalorder %s1637_s16, %s2298_s4 }
 0x26e   :  { %p1643_p7 = pnand %p1641_p6, %p1638_p5 }
 0x270   :  { %1646 = shalt.err (!%p1643_p7)
}
 0x271   :  { %1084 = dma.vmem_to_hbm [thread:$0]  %s1082_s2, 16, %s2298_s4, [#allocation4]  }
 0x272   :  { %1647 = dma.done.wait [#allocation4], 16  }
 0x273   :  { %1648 = vsyncadd [#allocation4], 4294967280 }
 0x274   :  { %1088 = vsyncpa [#allocation4], 1 }

</bundles_post_ra>
